<compile_context>
chip_gen: v7x
topology: tpu7x:2x2x1
jax: 0.10.0
libtpu: 0.0.40
codegen_flags: <defaults>
</compile_context>

<pallas_src>
import jax
import jax.numpy as jnp
from jax.experimental import pallas as pl
from jax.experimental.pallas import tpu as pltpu

EFST = 0.001          # floor on ||z||^2 (the module's `efst`)
NEG_INF = -1e30       # mask value for non-edges
M_INIT = -1e25        # running-max init/floor: NEG_INF - M_INIT << -100 so
                      # exp(masked - m) underflows to exactly 0 for non-edges


def _round_up(n, m):
    return (n + m - 1) // m * m


def _pick_tile(n, cap):
    """Largest tile in {512, 256, 128} <= cap dividing n (n is a multiple of 128)."""
    for t in (512, 256, 128):
        if t <= cap and n % t == 0:
            return t
    return 128


# ---------------------------------------------------------------------------
# Stage 1: node projection.  Per node tile:
#   z = x @ W.T, er, el (lane-dense row), zf = z / max(||z||^2, efst),
#   zf also emitted transposed (d_out, N) for the stage-2 similarity matmul.
# ---------------------------------------------------------------------------
def _proj_kernel(x_ref, wt_ref, alT_ref, ar_ref,
                 z_ref, zf_ref, zfT_ref, el_ref, er_ref):
    z = jnp.dot(x_ref[...], wt_ref[...],
                preferred_element_type=jnp.float32)              # (TN, D)

    # row-layout quantities
    er = jnp.sum(z * ar_ref[...], axis=-1, keepdims=True)        # (TN, 1)
    f = jnp.maximum(jnp.sum(z * z, axis=-1, keepdims=True), EFST)
    zf = z / f                                                    # (TN, D)

    # transposed quantities (single XLU transpose of the tile; everything else
    # is elementwise / sublane reductions)
    zT = jnp.transpose(z)                                         # (D, TN)
    el_row = jnp.sum(zT * alT_ref[...], axis=0, keepdims=True)    # (1, TN)
    fT = jnp.maximum(jnp.sum(zT * zT, axis=0, keepdims=True), EFST)
    zfT = zT / fT                                                 # (D, TN)

    z_ref[...] = z.astype(z_ref.dtype)        # bf16 (final aggregation)
    zf_ref[...] = zf.astype(zf_ref.dtype)     # bf16 (dst rows of similarity)
    zfT_ref[...] = zfT.astype(zfT_ref.dtype)  # bf16 (src cols of similarity)
    el_ref[...] = el_row                      # f32, lane-dense row
    er_ref[...] = er                          # f32 column


# ---------------------------------------------------------------------------
# Stage 2: per (dst tile, src tile) -- edge scores + online masked softmax +
# aggregation.  adjT[v, u] != 0 iff edge u -> v; softmax over src (lane axis),
# running (m, l, acc) across src tiles, normalize once at the last src tile.
# ---------------------------------------------------------------------------
def _attn_kernel(adjT_ref, zfv_ref, zfT_ref, el_ref, er_ref, z_ref, out_ref,
                 m_sc, l_sc, acc_sc):
    j = pl.program_id(1)

    @pl.when(j == 0)
    def _():
        m_sc[...] = jnp.full_like(m_sc, M_INIT)
        l_sc[...] = jnp.zeros_like(l_sc)
        acc_sc[...] = jnp.zeros_like(acc_sc)

    mask = adjT_ref[...] != 0                                     # (TV, TS)
    el = el_ref[...]                                              # (1, TS) src
    er = er_ref[...]                                              # (TV, 1) dst

    # relu(<zf_v, zf_u>) for this src tile (bf16 MXU, f32 accumulate)
    edp2 = jnp.maximum(
        jnp.dot(zfv_ref[...], zfT_ref[...],
                preferred_element_type=jnp.float32), 0.0)         # (TV, TS)
    logits = edp2 * (el + er)
    masked = jnp.where(mask, logits, NEG_INF)

    # online softmax update; m is floored at M_INIT so exp(NEG_INF - m)
    # underflows to exactly 0 (no second select needed, isolated dst -> 0 row)
    m_prev = m_sc[...]
    m_new = jnp.maximum(m_prev, jnp.max(masked, axis=-1, keepdims=True))
    alpha = jnp.exp(m_prev - m_new)                               # (TV, 1)
    p = jnp.exp(masked - m_new)                                   # (TV, TS)

    l_sc[...] = alpha * l_sc[...] + jnp.sum(p, axis=-1, keepdims=True)
    acc_sc[...] = alpha * acc_sc[...] + jnp.dot(
        p.astype(jnp.bfloat16), z_ref[...],
        preferred_element_type=jnp.float32)                       # (TV, D)
    m_sc[...] = m_new

    @pl.when(j == pl.num_programs(1) - 1)
    def _():
        # deferred normalization: divide the (TV, D) accumulator, not (TV, N)
        inv = pl.reciprocal(jnp.maximum(l_sc[...], 1e-30), approx=True)
        out_ref[...] = acc_sc[...] * inv


# ---------------------------------------------------------------------------
# Wrapper
# ---------------------------------------------------------------------------
def gat_conv_forward(feat, fc_weight, attn_l, attn_r, adj):
    """feat: (N, D_in), fc_weight: (H*D_out, D_in), attn_{l,r}: (1, H, D_out),
    adj: (N, N) mask with adj[src, dst] != 0 iff edge src -> dst.
    Returns (N, H, D_out) with H == 1."""
    N, d_in = feat.shape
    h, d_out = attn_l.shape[1], attn_l.shape[2]
    assert h == 1, "only num_heads=1 is shape-consistent in the source module"

    n_pad = _round_up(N, 128)
    pad = n_pad - N

    feat = feat.astype(jnp.float32)
    if pad:
        feat = jnp.pad(feat, ((0, pad), (0, 0)))
    wt = fc_weight.T.astype(jnp.float32)                        # (D_in, D_out)
    alT = attn_l.reshape(d_out, 1).astype(jnp.float32)          # column
    ar = attn_r.reshape(1, d_out).astype(jnp.float32)           # row

    # adjacency: cast to int8 BEFORE transposing (4x less traffic), pad with
    # zeros (padded nodes have no edges), then dst-major adjT[dst, src].
    # TODO(synk): cache adjT_i8 across calls for a static graph.
    adj_i8 = (adj != 0).astype(jnp.int8)
    if pad:
        adj_i8 = jnp.pad(adj_i8, ((0, pad), (0, pad)))
    adjT_i8 = adj_i8.T

    # ---- stage 1: projection + per-node stats -----------------------------
    tile_n = _pick_tile(n_pad, 256)
    z_bf, zf_bf, zfT_bf, el_row, er_col = pl.pallas_call(
        _proj_kernel,
        out_shape=(
            jax.ShapeDtypeStruct((n_pad, d_out), jnp.bfloat16),   # z
            jax.ShapeDtypeStruct((n_pad, d_out), jnp.bfloat16),   # zf (rows)
            jax.ShapeDtypeStruct((d_out, n_pad), jnp.bfloat16),   # zf^T
            jax.ShapeDtypeStruct((1, n_pad), jnp.float32),        # el (row)
            jax.ShapeDtypeStruct((n_pad, 1), jnp.float32),        # er (col)
        ),
        grid=(n_pad // tile_n,),
        in_specs=[
            pl.BlockSpec((tile_n, d_in), lambda i: (i, 0)),
            pl.BlockSpec((d_in, d_out), lambda i: (0, 0)),
            pl.BlockSpec((d_out, 1), lambda i: (0, 0)),
            pl.BlockSpec((1, d_out), lambda i: (0, 0)),
        ],
        out_specs=(
            pl.BlockSpec((tile_n, d_out), lambda i: (i, 0)),
            pl.BlockSpec((tile_n, d_out), lambda i: (i, 0)),
            pl.BlockSpec((d_out, tile_n), lambda i: (0, i)),
            pl.BlockSpec((1, tile_n), lambda i: (0, i)),
            pl.BlockSpec((tile_n, 1), lambda i: (i, 0)),
        ),
        compiler_params=pltpu.CompilerParams(
            dimension_semantics=("parallel",)),
    )(feat, wt, alT, ar)

    # ---- stage 2: online edge-softmax + aggregation ------------------------
    tile_v = _pick_tile(n_pad, 256)   # dst tile (cap 256 for v7x 64 MiB VMEM)
    tile_s = _pick_tile(n_pad, 512)   # src tile (streamed reduction axis)
    out = pl.pallas_call(
        _attn_kernel,
        out_shape=jax.ShapeDtypeStruct((n_pad, d_out), jnp.float32),
        grid=(n_pad // tile_v, n_pad // tile_s),
        in_specs=[
            pl.BlockSpec((tile_v, tile_s), lambda i, j: (i, j)),   # adjT block
            pl.BlockSpec((tile_v, d_out), lambda i, j: (i, 0)),    # zf dst rows
            pl.BlockSpec((d_out, tile_s), lambda i, j: (0, j)),    # zf^T src
            pl.BlockSpec((1, tile_s), lambda i, j: (0, j)),        # el src row
            pl.BlockSpec((tile_v, 1), lambda i, j: (i, 0)),        # er dst col
            pl.BlockSpec((tile_s, d_out), lambda i, j: (j, 0)),    # z src rows
        ],
        out_specs=pl.BlockSpec((tile_v, d_out), lambda i, j: (i, 0)),
        scratch_shapes=[
            pltpu.VMEM((tile_v, 1), jnp.float32),       # running max m
            pltpu.VMEM((tile_v, 1), jnp.float32),       # running denom l
            pltpu.VMEM((tile_v, d_out), jnp.float32),   # running numerator
        ],
        compiler_params=pltpu.CompilerParams(
            dimension_semantics=("parallel", "arbitrary"),
            vmem_limit_bytes=32 * 1024 * 1024),
    )(adjT_i8, zf_bf, zfT_bf, el_row, er_col, z_bf)

    if pad:
        out = out[:N]
    return out.reshape(N, h, d_out)


def gat_conv_ref(feat, fc_weight, attn_l, attn_r, adj):
    """Pure-JAX reference mirroring the original module's math (f32)."""
    z = feat @ fc_weight.T                            # (N, D_out)
    al = attn_l.reshape(1, -1)
    ar = attn_r.reshape(1, -1)
    el = (z * al).sum(-1, keepdims=True)              # (N, 1)
    er = (z * ar).sum(-1, keepdims=True)              # (N, 1)
    s = z @ z.T
    f = jnp.maximum((z * z).sum(-1, keepdims=True), EFST)
    edp_ftfd = (1.0 / f) * (1.0 / f).T
    logits = jnp.maximum(s * edp_ftfd, 0.0) * (el + er.T)
    masked = jnp.where(adj > 0.0, logits, NEG_INF)
    m = masked.max(0, keepdims=True)
    p = jnp.where(adj > 0.0, jnp.exp(masked - m), 0.0)
    a = p / jnp.maximum(p.sum(0, keepdims=True), 1e-30)
    return (a.T @ z).reshape(z.shape[0], 1, z.shape[1])


if __name__ == "__main__":
    D_IN, D_OUT, H = 32, 32, 1
    key = jax.random.PRNGKey(0)
    k_w, k_al, k_ar, k_data = jax.random.split(key, 4)

    # deterministic xavier_normal-style init (gain = calculate_gain('relu'))
    gain = jnp.sqrt(2.0)
    std_w = gain * jnp.sqrt(2.0 / (D_IN + H * D_OUT))
    fc_weight = std_w * jax.random.normal(k_w, (H * D_OUT, D_IN), jnp.float32)
    std_a = gain * jnp.sqrt(2.0 / (2.0 * D_OUT))
    attn_l = std_a * jax.random.normal(k_al, (1, H, D_OUT), jnp.float32)
    attn_r = std_a * jax.random.normal(k_ar, (1, H, D_OUT), jnp.float32)

    # two small configs: one already 128-aligned (3x3 grid exercises the
    # online softmax across src tiles), one that exercises the padding path.
    for N in (384, 320):
        k_x, k_adj, k_data = jax.random.split(k_data, 3)
        x = jax.random.normal(k_x, (N, D_IN), jnp.float32)
        # random directed graph; self loops ensure every dst has >=1 in-edge
        adj = (jax.random.uniform(k_adj, (N, N)) < 0.10).astype(jnp.float32)
        adj = jnp.maximum(adj, jnp.eye(N, dtype=jnp.float32))

        out = gat_conv_forward(x, fc_weight, attn_l, attn_r, adj)
        out = jax.block_until_ready(out)

        ref = gat_conv_ref(x, fc_weight, attn_l, attn_r, adj)
        assert out.shape == (N, H, D_OUT)
        assert jnp.allclose(out, ref, rtol=2e-2, atol=2e-2), (
            f"mismatch vs JAX reference at N={N}")

    # TODO(synk): feat_drop / attn_drop are identity (p=0.0 default); residual
    # and activation paths are disabled by the module defaults.
    print("KERNEL_OK")
</pallas_src>

<mosaic_0001>
module attributes {stable_mosaic.version = 11 : i64} {
  func.func @_proj_kernel(%arg0: i32, %arg1: memref<128x32xf32, #tpu.memory_space<vmem>>, %arg2: memref<32x32xf32, #tpu.memory_space<vmem>>, %arg3: memref<32x1xf32, #tpu.memory_space<vmem>>, %arg4: memref<1x32xf32, #tpu.memory_space<vmem>>, %arg5: memref<128x32xbf16, #tpu.memory_space<vmem>>, %arg6: memref<128x32xbf16, #tpu.memory_space<vmem>>, %arg7: memref<32x128xbf16, #tpu.memory_space<vmem>>, %arg8: memref<1x128xf32, #tpu.memory_space<vmem>>, %arg9: memref<128x1xf32, #tpu.memory_space<vmem>>) attributes {dimension_semantics = [#tpu.dimension_semantics<parallel>], iteration_bounds = array<i64: 3>, scalar_prefetch = 0 : i64, scratch_operands = 0 : i64, tpu.core_type = #tpu.core_type<tc>, window_params = [{transform_indices = @transform_0, window_bounds = array<i64: 128, 32>}, {pipeline_mode = #tpu.pipeline_mode<synchronous>, transform_indices = @transform_1, window_bounds = array<i64: 32, 32>}, {pipeline_mode = #tpu.pipeline_mode<synchronous>, transform_indices = @transform_2, window_bounds = array<i64: 32, 1>}, {pipeline_mode = #tpu.pipeline_mode<synchronous>, transform_indices = @transform_3, window_bounds = array<i64: 1, 32>}, {transform_indices = @transform_4, window_bounds = array<i64: 128, 32>}, {transform_indices = @transform_5, window_bounds = array<i64: 128, 32>}, {transform_indices = @transform_6, window_bounds = array<i64: 32, 128>}, {transform_indices = @transform_7, window_bounds = array<i64: 1, 128>}, {transform_indices = @transform_8, window_bounds = array<i64: 128, 1>}]} {
    %c0 = arith.constant 0 : index
    %c0_0 = arith.constant 0 : index
    %0 = vector.load %arg1[%c0, %c0_0] : memref<128x32xf32, #tpu.memory_space<vmem>>, vector<128x32xf32>
    %c0_1 = arith.constant 0 : index
    %c0_2 = arith.constant 0 : index
    %1 = vector.load %arg2[%c0_1, %c0_2] : memref<32x32xf32, #tpu.memory_space<vmem>>, vector<32x32xf32>
    %cst = arith.constant dense<0.000000e+00> : vector<128x32xf32>
    %2 = tpu.matmul %0, %1, %cst {dimension_numbers = #tpu.dot_dimension_numbers<[1], [0], [0], [1], [0, 0, 1, 1], [], []>} : vector<128x32xf32>, vector<32x32xf32>, vector<128x32xf32> -> vector<128x32xf32>
    %c0_3 = arith.constant 0 : index
    %c0_4 = arith.constant 0 : index
    %3 = vector.load %arg4[%c0_3, %c0_4] : memref<1x32xf32, #tpu.memory_space<vmem>>, vector<1x32xf32>
    %4 = vector.broadcast %3 : vector<1x32xf32> to vector<128x32xf32>
    %5 = arith.mulf %2, %4 : vector<128x32xf32>
    %cst_5 = arith.constant dense<0.000000e+00> : vector<128xf32>
    %6 = vector.multi_reduction <add>, %5, %cst_5 [1] : vector<128x32xf32> to vector<128xf32>
    %7 = vector.shape_cast %6 : vector<128xf32> to vector<128x1xf32>
    %8 = arith.mulf %2, %2 : vector<128x32xf32>
    %cst_6 = arith.constant dense<0.000000e+00> : vector<128xf32>
    %9 = vector.multi_reduction <add>, %8, %cst_6 [1] : vector<128x32xf32> to vector<128xf32>
    %10 = vector.shape_cast %9 : vector<128xf32> to vector<128x1xf32>
    %cst_7 = arith.constant 1.000000e-03 : f32
    %11 = vector.broadcast %cst_7 : f32 to vector<128x1xf32>
    %12 = arith.maximumf %10, %11 : vector<128x1xf32>
    %13 = vector.broadcast %12 : vector<128x1xf32> to vector<128x32xf32>
    %14 = arith.divf %2, %13 : vector<128x32xf32>
    %15 = tpu.transpose %2, [1, 0] : vector<128x32xf32> -> vector<32x128xf32>
    %c0_8 = arith.constant 0 : index
    %c0_9 = arith.constant 0 : index
    %16 = vector.load %arg3[%c0_8, %c0_9] : memref<32x1xf32, #tpu.memory_space<vmem>>, vector<32x1xf32>
    %17 = vector.broadcast %16 : vector<32x1xf32> to vector<32x128xf32>
    %18 = arith.mulf %15, %17 : vector<32x128xf32>
    %cst_10 = arith.constant dense<0.000000e+00> : vector<128xf32>
    %19 = vector.multi_reduction <add>, %18, %cst_10 [0] : vector<32x128xf32> to vector<128xf32>
    %20 = vector.shape_cast %19 : vector<128xf32> to vector<1x128xf32>
    %21 = arith.mulf %15, %15 : vector<32x128xf32>
    %cst_11 = arith.constant dense<0.000000e+00> : vector<128xf32>
    %22 = vector.multi_reduction <add>, %21, %cst_11 [0] : vector<32x128xf32> to vector<128xf32>
    %23 = vector.shape_cast %22 : vector<128xf32> to vector<1x128xf32>
    %cst_12 = arith.constant 1.000000e-03 : f32
    %24 = vector.broadcast %cst_12 : f32 to vector<1x128xf32>
    %25 = arith.maximumf %23, %24 : vector<1x128xf32>
    %26 = vector.broadcast %25 : vector<1x128xf32> to vector<32x128xf32>
    %27 = arith.divf %15, %26 : vector<32x128xf32>
    %28 = arith.truncf %2 : vector<128x32xf32> to vector<128x32xbf16>
    %c0_13 = arith.constant 0 : index
    %c0_14 = arith.constant 0 : index
    %29 = vector.load %arg5[%c0_13, %c0_14] : memref<128x32xbf16, #tpu.memory_space<vmem>>, vector<128x32xbf16>
    tpu.vector_store %arg5[%c0_13, %c0_14], %28 {strides = array<i32>} : memref<128x32xbf16, #tpu.memory_space<vmem>>, vector<128x32xbf16>,
    %30 = arith.truncf %14 : vector<128x32xf32> to vector<128x32xbf16>
    %c0_15 = arith.constant 0 : index
    %c0_16 = arith.constant 0 : index
    %31 = vector.load %arg6[%c0_15, %c0_16] : memref<128x32xbf16, #tpu.memory_space<vmem>>, vector<128x32xbf16>
    tpu.vector_store %arg6[%c0_15, %c0_16], %30 {strides = array<i32>} : memref<128x32xbf16, #tpu.memory_space<vmem>>, vector<128x32xbf16>,
    %32 = arith.truncf %27 : vector<32x128xf32> to vector<32x128xbf16>
    %c0_17 = arith.constant 0 : index
    %c0_18 = arith.constant 0 : index
    %33 = vector.load %arg7[%c0_17, %c0_18] : memref<32x128xbf16, #tpu.memory_space<vmem>>, vector<32x128xbf16>
    tpu.vector_store %arg7[%c0_17, %c0_18], %32 {strides = array<i32>} : memref<32x128xbf16, #tpu.memory_space<vmem>>, vector<32x128xbf16>,
    %c0_19 = arith.constant 0 : index
    %c0_20 = arith.constant 0 : index
    %34 = vector.load %arg8[%c0_19, %c0_20] : memref<1x128xf32, #tpu.memory_space<vmem>>, vector<1x128xf32>
    tpu.vector_store %arg8[%c0_19, %c0_20], %20 {strides = array<i32>} : memref<1x128xf32, #tpu.memory_space<vmem>>, vector<1x128xf32>,
    %c0_21 = arith.constant 0 : index
    %c0_22 = arith.constant 0 : index
    %35 = vector.load %arg9[%c0_21, %c0_22] : memref<128x1xf32, #tpu.memory_space<vmem>>, vector<128x1xf32>
    tpu.vector_store %arg9[%c0_21, %c0_22], %7 {strides = array<i32>} : memref<128x1xf32, #tpu.memory_space<vmem>>, vector<128x1xf32>,
    return
  }
  func.func @transform_0(%arg0: i32) -> (i32, i32) {
    %c0_i32 = arith.constant 0 : i32
    %c0_i32_0 = arith.constant 0 : i32
    return %arg0, %c0_i32 : i32, i32
  }
  func.func @transform_1(%arg0: i32) -> (i32, i32) {
    %c0_i32 = arith.constant 0 : i32
    %c0_i32_0 = arith.constant 0 : i32
    %c0_i32_1 = arith.constant 0 : i32
    return %c0_i32, %c0_i32_0 : i32, i32
  }
  func.func @transform_2(%arg0: i32) -> (i32, i32) {
    %c0_i32 = arith.constant 0 : i32
    %c0_i32_0 = arith.constant 0 : i32
    %c0_i32_1 = arith.constant 0 : i32
    return %c0_i32, %c0_i32_0 : i32, i32
  }
  func.func @transform_3(%arg0: i32) -> (i32, i32) {
    %c0_i32 = arith.constant 0 : i32
    %c0_i32_0 = arith.constant 0 : i32
    %c0_i32_1 = arith.constant 0 : i32
    return %c0_i32, %c0_i32_0 : i32, i32
  }
  func.func @transform_4(%arg0: i32) -> (i32, i32) {
    %c0_i32 = arith.constant 0 : i32
    %c0_i32_0 = arith.constant 0 : i32
    return %arg0, %c0_i32 : i32, i32
  }
  func.func @transform_5(%arg0: i32) -> (i32, i32) {
    %c0_i32 = arith.constant 0 : i32
    %c0_i32_0 = arith.constant 0 : i32
    return %arg0, %c0_i32 : i32, i32
  }
  func.func @transform_6(%arg0: i32) -> (i32, i32) {
    %c0_i32 = arith.constant 0 : i32
    %c0_i32_0 = arith.constant 0 : i32
    return %c0_i32, %arg0 : i32, i32
  }
  func.func @transform_7(%arg0: i32) -> (i32, i32) {
    %c0_i32 = arith.constant 0 : i32
    %c0_i32_0 = arith.constant 0 : i32
    return %c0_i32, %arg0 : i32, i32
  }
  func.func @transform_8(%arg0: i32) -> (i32, i32) {
    %c0_i32 = arith.constant 0 : i32
    %c0_i32_0 = arith.constant 0 : i32
    return %arg0, %c0_i32 : i32, i32
  }
}

</mosaic_0001>

<bundles_post_ra>
// kernel: tpu_custom_call.1
= control target key start
LH: loop header
LB: loop body
LE: loop exit
PB: predicated region body
PF: predicated region fallthrough
CT: control target
= control target key end

     0   :  { %14 = vsyncpa [#allocation3], 0  ;;  %s2210_s0 = inlined_call_operand.vmem [shape: f32[384,32], index: 0, kind: input, shape index: {}]   ;;  %s2211_s1 = inlined_call_operand.vmem [shape: f32[32,32], index: 1, kind: input, shape index: {}]   ;;  %s2212_s2 = inlined_call_operand.vmem [shape: f32[32,1], index: 2, kind: input, shape index: {}]   ;;  %s2213_s3 = inlined_call_operand.vmem [shape: f32[1,32], index: 3, kind: input, shape index: {}]   ;;  %s2214_s4 = inlined_call_operand.vmem [shape: bf16[384,32], index: 4, kind: output, shape index: {0}]   ;;  %s2215_s5 = inlined_call_operand.vmem [shape: bf16[384,32], index: 5, kind: output, shape index: {1}]   ;;  %s2216_s6 = inlined_call_operand.hbm [shape: bf16[32,384], index: 6, kind: output, shape index: {2}]   ;;  %s2217_s7 = inlined_call_operand.hbm [shape: f32[1,384], index: 7, kind: output, shape index: {3}]   ;;  %s2218_s8 = inlined_call_operand.vmem [shape: f32[384,1], index: 8, kind: output, shape index: {4}]  }
   0x1   :  { %16 = vsyncpa [#allocation3 + $0x1], 0 }
   0x2   :  { %17 = vsyncpa [#allocation5], 0 }
   0x3   :  { %19 = vsyncpa [#allocation5 + $0x1], 0  ;;  %s1674_s27 = smov 0   ;;  %s1676_s28 = smov 0  }
   0x4   :  { %s1678_s29 = smov 0   ;;  %s1680_s30 = smov 0  }
   0x5 LB: > { %s1695_s9 = sadd.s32 4294967295, %s1621_s30   ;;  %s1261_s10 = sadd.s32 4294967294, %s1621_s30   ;;  %s1621_s30 = sphi %s1680_s30, %s2224_s30   ;;  %s1617_s29 = sphi %s1678_s29, %s2223_s29   ;;  %s1613_s28 = sphi %s1676_s28, %s2222_s28   ;;  %s1609_s27 = sphi %s1674_s27, %s2221_s27  }
   0x6   : > { %s1699_s11 = sadd.s32 1, %s1621_s30   ;;  %s173_s12 = sadd.s32 1, %s1617_s29 }
   0x7   : > { %s170_s13 = ssub.s32 %s1621_s30, %s1699_s11  ;;  %p183_p0 = scmp.ne.s32.totalorder %s1617_s29, %s1613_s28 }
   0x8   : > { %p171_p1 = scmp.eq.s32.totalorder %s170_s13, 0  ;;  %p184_p2 = scmp.eq.s32.totalorder %s1695_s9, 2 }
   0x9   : > { %p189_p3 = scmp.ne.s32.totalorder %s1613_s28, %s1609_s27  ;;  %p190_p4 = scmp.eq.s32.totalorder %s1261_s10, 2 }
   0xa   : > { %s1710_s14 = scalar_select %p171_p1, %s1617_s29, %s173_s12  }
   0xb   : > { %p1712_p5 = por %p184_p2, %p183_p0  ;;  %p1716_p6 = por %p190_p4, %p189_p3 }
   0xc   : > { %p1264_p7 = scmp.ge.s32.totalorder %s1621_s30, 1  ;;  %p278_p8 = scmp.lt.s32.totalorder %s1621_s30, 4 }
   0xe   : > { %p279_p9 = pnand %p1264_p7, %p278_p8 }
   0xf   : > { %v371_v0 = vld [vmem:[%s2211_s1] sm:$0xff] (!%p279_p9)  ;;  %v372_v1 = vld [vmem:[%s2211_s1 + $0x8] sm:$0xff] (!%p279_p9)  ;;  %v373_v2 = vld [vmem:[%s2211_s1 + $0x10] sm:$0xff] (!%p279_p9)  ;;  %s1732_s23 = sshll.u32 (!%p279_p9), %s1695_s9, 4  ;;  %vm375_vm0 = vcmask (!%p279_p9), 261120   ;;  %v1623_v22 = vmov (!%p279_p9), 0  }
  0x10   : > { %282 = sbr.rel (%p279_p9) target bundleno = 572 (0x23c), region = 36  ;;  %v1431_v3 = vpack.c.bf16 (!%p279_p9), %v372_v1, %v371_v0  ;;  %v374_v4 = vld [vmem:[%s2211_s1 + $0x18] sm:$0xff] (!%p279_p9)  ;;  %p332_p10 = scmp.lt.s32.totalorder (!%p279_p9), %s1732_s23, 47  ;;  %1492 = vset.pattern.permute.xlu1 (!%p279_p9), %v1623_v22  ;;  %1491 = vset.pattern.permute.xlu0 (!%p279_p9), %v1623_v22  ;;  %v1785_v23 = vld [vmem:[%s2213_s3] ss:$0 sm:$0xff] (!%p279_p9)  ;;  %vm904_vm1 = vcmask (!%p279_p9), 257024  }
  0x11   : > { %v1435_v5 = vpack.c.bf16 (!%p279_p9), %v374_v4, %v373_v2  ;;  %vm1022_vm2 = vcmask (!%p279_p9), 7168   ;;  %s2131_s22 = scalar_lea.hbm (!%p279_p9), %s2217_s7, %s1732_s23 }
  0x12   : > { %1432 = vmatprep.subr.bf16.mxu0 (!%p279_p9), %v1431_v3  ;;  %1439 = vmatprep.subr.bf16.mxu1 (!%p279_p9), %v1431_v3 }
  0x13   : > { %1434 = vmatpush3.bf16.msra.mxu0 (!%p279_p9), %v1431_v3  ;;  %1441 = vmatpush3.bf16.msra.mxu1 (!%p279_p9), %v1431_v3 }
  0x14   : > { %1436 = vmatprep.subr.bf16.mxu0 (!%p279_p9), %v1435_v5  ;;  %1440 = vmatprep.subr.bf16.mxu1 (!%p279_p9), %v1435_v5 }
  0x17   : > { %s1739_s26 = scalar_select %p332_p10, %s1732_s23, 47  ;;  %1438 = vmatpush3.bf16.msra.mxu0 %v1435_v5  ;;  %1442 = vmatpush3.bf16.msra.mxu1 %v1435_v5 }
  0x19   : > { %s1267_s10 = sshll.u32 %s1739_s26, 3  ;;  %s1269_s18 = sshll.u32 %s1739_s26, 2 }
  0x1a   : > { %s1747_s17 = scalar_lea.vmem %s2210_s0, %s1267_s10  ;;  %s1792_s24 = scalar_lea.vmem %s2214_s4, %s1269_s18 }
  0x1b   : > { %v355_v6 = vld [vmem:[%s1747_s17] sm:$0xff]  ;;  %v356_v8 = vld [vmem:[%s1747_s17 + $0x8] sm:$0xff]  ;;  %v357_v10 = vld [vmem:[%s1747_s17 + $0x10] sm:$0xff]  ;;  %s2007_s12 = scalar_lea.vmem %s2218_s8, %s1267_s10  ;;  %s2124_s26 = sand.u32 1, %s1613_s28  }
  0x1c   : > { %v363_v7 = vld [vmem:[%s1747_s17 + $0x40] sm:$0xff]  ;;  %v364_v9 = vld [vmem:[%s1747_s17 + $0x48] sm:$0xff]  ;;  %1407 = vmatprep.mubr.msk.f32.mxu0 %vm375_vm0, %v355_v6  ;;  %v365_v11 = vld [vmem:[%s1747_s17 + $0x50] sm:$0xff] }
  0x1d   : > { %1419 = vmatprep.mubr.msk.f32.mxu1 %vm375_vm0, %v363_v7  ;;  %1408 = vmatmul.mubr.msk.f32.vlgmr.msra.gmra.mrb[0].mxu0 %vm375_vm0, %v356_v8  ;;  %v358_v12 = vld [vmem:[%s1747_s17 + $0x18] sm:$0xff]  ;;  %v359_v14 = vld [vmem:[%s1747_s17 + $0x20] sm:$0xff]  ;;  %v360_v16 = vld [vmem:[%s1747_s17 + $0x28] sm:$0xff] }
  0x1e   : > { %1420 = vmatmul.mubr.msk.f32.vlgmr.msra.gmra.mrb[0].mxu1 %vm375_vm0, %v364_v9  ;;  %1410 = vmatprep.mubr.msk.f32.mxu0 %vm375_vm0, %v357_v10  ;;  %v366_v13 = vld [vmem:[%s1747_s17 + $0x58] sm:$0xff]  ;;  %v367_v15 = vld [vmem:[%s1747_s17 + $0x60] sm:$0xff]  ;;  %v368_v17 = vld [vmem:[%s1747_s17 + $0x68] sm:$0xff] }
  0x1f   : > { %1422 = vmatprep.mubr.msk.f32.mxu1 %vm375_vm0, %v365_v11  ;;  %v361_v18 = vld [vmem:[%s1747_s17 + $0x30] sm:$0xff]  ;;  %v362_v20 = vld [vmem:[%s1747_s17 + $0x38] sm:$0xff] }
  0x20   : > { %v369_v19 = vld [vmem:[%s1747_s17 + $0x70] sm:$0xff]  ;;  %v370_v21 = vld [vmem:[%s1747_s17 + $0x78] sm:$0xff]  ;;  %s2032_s17 = scalar_lea.vmem %s2215_s5, %s1269_s18  ;;  %s323_s18 = scalar_lea.vmem [#allocation4], %s2124_s26 }
  0x21   : > { %1411 = vmatmul.mubr.msk.f32.gmra.mrb[2].mxu0 %vm375_vm0, %v358_v12  ;;  %s1095_s19 = sshll.u32 %s323_s18, 4  ;;  %s2133_s19 = int_to_ptr.vmem [resolvable:$true] %s1095_s19 }
  0x22   : > { %1423 = vmatmul.mubr.msk.f32.gmra.mrb[2].mxu1 %vm375_vm0, %v366_v13  ;;  %1413 = vmatprep.mubr.msk.f32.mxu0 %vm375_vm0, %v359_v14  ;;  %s1527_s25 = scalar_lea.vmem %s2133_s19, 16 }
  0x23   : > { %1425 = vmatprep.mubr.msk.f32.mxu1 %vm375_vm0, %v367_v15  ;;  %p1528_p11 = scmp.ne.s32.totalorder %s2133_s19, %s1527_s25 }
  0x25   : > { %1414 = vmatmul.mubr.msk.f32.gmra.mrb[4].mxu0 %vm375_vm0, %v360_v16  ;;  %p1529_p12 = pnand %p1528_p11, %p1712_p5 }
  0x26   : > { %1426 = vmatmul.mubr.msk.f32.gmra.mrb[4].mxu1 %vm375_vm0, %v368_v17  ;;  %1416 = vmatprep.mubr.msk.f32.mxu0 %vm375_vm0, %v361_v18 }
  0x27   : > { %1428 = vmatprep.mubr.msk.f32.mxu1 %vm375_vm0, %v369_v19  ;;  %p1530_p13 = pneg %p1529_p12 }
  0x29   : > { %1417 = vmatmul.mubr.msk.f32.gmra.mrb[6].mxu0 %vm375_vm0, %v362_v20 }
  0x2a   : > { %1429 = vmatmul.mubr.msk.f32.gmra.mrb[6].mxu1 %vm375_vm0, %v370_v21 }
  0xf0   : > { %v1794_v24 = vpop.f32.mrb[0].mxu0 }
  0xf1   : > { %v1796_v25 = vpop.f32.mrb[0].mxu1  ;;  %v1333_v26 = vpack.c.bf16 %v1794_v24, %v1794_v24  ;;  %v577_v30 = vmul.f32 %v1794_v24, %v1785_v23  ;;  %v1808_v31 = vpop.f32.mrb[1].mxu0  ;;  %v641_v34 = vmul.f32 %v1794_v24, %v1794_v24 }
  0xf2   : > { %v1341_v27 = vpack.c.bf16 %v1796_v25, %v1796_v25  ;;  %v1802_v28 = vpop.f32.mrb[1].mxu1  ;;  %v585_v29 = vmul.f32 %v1796_v25, %v1785_v23  ;;  %v1332_v33 = vpack.c.bf16 %v1808_v31, %v1808_v31  ;;  %v576_v35 = vmul.f32 %v1785_v23, %v1808_v31 }
  0xf3   : > { %v1340_v32 = vpack.c.bf16 %v1802_v28, %v1802_v28  ;;  %906 = vst.msk [vmem:[%s1792_s24 + $0x4] sm:$0xf] %vm904_vm1, %v1333_v26  ;;  %v595_v37 = vsel %vm375_vm0, %v577_v30, 0.0  ;;  %v659_v40 = vsel %vm375_vm0, %v641_v34, 0.0  ;;  %v649_v46 = vmul.f32 %v1796_v25, %v1796_v25 }
  0xf4   : > { %914 = vst.msk [vmem:[%s1792_s24 + $0x24] sm:$0xf] %vm904_vm1, %v1341_v27  ;;  %v619_v36 = vsel %vm375_vm0, %v585_v29, 0.0  ;;  %596 = vadd.xlane.f32.xlu0 %v595_v37  ;;  %905 = vst.msk [vmem:[%s1792_s24] sm:$0xf] %vm904_vm1, %v1332_v33  ;;  %v1828_v38 = vpop.f32.mrb[2].mxu0  ;;  %v584_v49 = vmul.f32 %v1785_v23, %v1802_v28  ;;  %v640_v57 = vmul.f32 %v1808_v31, %v1808_v31 }
  0xf5   : > { %913 = vst.msk [vmem:[%s1792_s24 + $0x20] sm:$0xf] %vm904_vm1, %v1340_v32  ;;  %620 = vadd.xlane.f32.xlu1 %v619_v36  ;;  %v1830_v39 = vpop.f32.mrb[2].mxu1  ;;  %v592_v41 = vsel %vm375_vm0, %v576_v35, 0.0  ;;  %v1335_v42 = vpack.c.bf16 %v1828_v38, %v1828_v38  ;;  %v1836_v43 = vpop.f32.mrb[3].mxu0  ;;  %v579_v52 = vmul.f32 %v1828_v38, %v1785_v23  ;;  %v683_v56 = vsel %vm375_vm0, %v649_v46, 0.0 }
  0xf6   : > { %v1343_v44 = vpack.c.bf16 %v1830_v39, %v1830_v39  ;;  %v1840_v45 = vpop.f32.mrb[3].mxu1  ;;  %v1334_v47 = vpack.c.bf16 %v1836_v43, %v1836_v43  ;;  %v616_v58 = vsel %vm375_vm0, %v584_v49, 0.0  ;;  %v587_v1 = vmul.f32 %v1830_v39, %v1785_v23 }
  0xf7   : > { %v1342_v48 = vpack.c.bf16 %v1840_v45, %v1840_v45  ;;  %908 = vst.msk [vmem:[%s1792_s24 + $0xc] sm:$0xf] %vm904_vm1, %v1335_v42  ;;  %v601_v0 = vsel %vm375_vm0, %v579_v52, 0.0  ;;  %v656_v5 = vsel %vm375_vm0, %v640_v57, 0.0  ;;  %v648_v6 = vmul.f32 %v1802_v28, %v1802_v28 }
  0xf8   : > { %916 = vst.msk [vmem:[%s1792_s24 + $0x2c] sm:$0xf] %vm904_vm1, %v1343_v44  ;;  %593 = vadd.xlane.f32.xlu0 %v592_v41  ;;  %907 = vst.msk [vmem:[%s1792_s24 + $0x8] sm:$0xf] %vm904_vm1, %v1334_v47  ;;  %v1858_v50 = vpop.f32.mrb[4].mxu0  ;;  %v625_v10 = vsel %vm375_vm0, %v587_v1, 0.0  ;;  %v586_v12 = vmul.f32 %v1785_v23, %v1840_v45  ;;  %v643_v13 = vmul.f32 %v1828_v38, %v1828_v38 }
  0xf9   : > { %660 = vadd.xlane.f32.xlu1 %v659_v40  ;;  %915 = vst.msk [vmem:[%s1792_s24 + $0x28] sm:$0xf] %vm904_vm1, %v1342_v48  ;;  %v1860_v51 = vpop.f32.mrb[4].mxu1  ;;  %v1337_v53 = vpack.c.bf16 %v1858_v50, %v1858_v50  ;;  %v1866_v54 = vpop.f32.mrb[5].mxu0  ;;  %v680_v11 = vsel %vm375_vm0, %v648_v6, 0.0  ;;  %v651_v16 = vmul.f32 %v1830_v39, %v1830_v39  ;;  %v642_v17 = vmul.f32 %v1836_v43, %v1836_v43 }
  0xfa   : > { %v1868_v55 = vpop.f32.mrb[5].mxu1  ;;  %v1336_v59 = vpack.c.bf16 %v1866_v54, %v1866_v54  ;;  %v1345_v60 = vpack.c.bf16 %v1860_v51, %v1860_v51  ;;  %v622_v14 = vsel %vm375_vm0, %v586_v12, 0.0  ;;  %v665_v15 = vsel %vm375_vm0, %v643_v13, 0.0 }
  0xfb   : > { %910 = vst.msk [vmem:[%s1792_s24 + $0x14] sm:$0xf] %vm904_vm1, %v1337_v53  ;;  %v1344_v61 = vpack.c.bf16 %v1868_v55, %v1868_v55  ;;  %v689_v18 = vsel %vm375_vm0, %v651_v16, 0.0  ;;  %v662_v19 = vsel %vm375_vm0, %v642_v17, 0.0  ;;  %v650_v20 = vmul.f32 %v1840_v45, %v1840_v45 }
  0xfc   : > { %617 = vadd.xlane.f32.xlu0 %v616_v58  ;;  %v1882_v62 = vpop.f32.mrb[6].mxu0  ;;  %909 = vst.msk [vmem:[%s1792_s24 + $0x10] sm:$0xf] %vm904_vm1, %v1336_v59  ;;  %918 = vst.msk [vmem:[%s1792_s24 + $0x34] sm:$0xf] %vm904_vm1, %v1345_v60  ;;  %v578_v21 = vmul.f32 %v1785_v23, %v1836_v43  ;;  %v581_v22 = vmul.f32 %v1858_v50, %v1785_v23  ;;  %v580_v26 = vmul.f32 %v1785_v23, %v1866_v54 }
  0xfd   : > { %684 = vadd.xlane.f32.xlu1 %v683_v56  ;;  %v1884_v63 = vpop.f32.mrb[6].mxu1  ;;  %917 = vst.msk [vmem:[%s1792_s24 + $0x30] sm:$0xf] %vm904_vm1, %v1344_v61  ;;  %v1339_v2 = vpack.c.bf16 %v1882_v62, %v1882_v62  ;;  %v1897_v3 = vpop.f32.mrb[7].mxu0  ;;  %v686_v27 = vsel %vm375_vm0, %v650_v20, 0.0  ;;  %v589_v33 = vmul.f32 %v1860_v51, %v1785_v23  ;;  %v588_v34 = vmul.f32 %v1785_v23, %v1868_v55 }
  0xfe   : > { %v1899_v4 = vpop.f32.mrb[7].mxu1  ;;  %v1338_v7 = vpack.c.bf16 %v1897_v3, %v1897_v3  ;;  %v1347_v8 = vpack.c.bf16 %v1884_v63, %v1884_v63  ;;  %v598_v29 = vsel %vm375_vm0, %v578_v21, 0.0  ;;  %v607_v30 = vsel %vm375_vm0, %v581_v22, 0.0 }
  0xff   : > { %912 = vst.msk [vmem:[%s1792_s24 + $0x1c] sm:$0xf] %vm904_vm1, %v1339_v2  ;;  %v1346_v9 = vpack.c.bf16 %v1899_v4, %v1899_v4  ;;  %v604_v32 = vsel %vm375_vm0, %v580_v26, 0.0  ;;  %v631_v35 = vsel %vm375_vm0, %v589_v33, 0.0  ;;  %v628_v36 = vsel %vm375_vm0, %v588_v34, 0.0 }
 0x100   : > { %657 = vadd.xlane.f32.xlu0 %v656_v5  ;;  %911 = vst.msk [vmem:[%s1792_s24 + $0x18] sm:$0xf] %vm904_vm1, %v1338_v7  ;;  %920 = vst.msk [vmem:[%s1792_s24 + $0x3c] sm:$0xf] %vm904_vm1, %v1347_v8  ;;  %v645_v37 = vmul.f32 %v1858_v50, %v1858_v50  ;;  %v644_v40 = vmul.f32 %v1866_v54, %v1866_v54  ;;  %v653_v44 = vmul.f32 %v1860_v51, %v1860_v51  ;;  %v785_v8 = vld [vmem:[%s2212_s2 + $0x8] sm:$0xff] }
 0x101   : > { %602 = vadd.xlane.f32.xlu1 %v601_v0  ;;  %919 = vst.msk [vmem:[%s1792_s24 + $0x38] sm:$0xf] %vm904_vm1, %v1346_v9  ;;  %v652_v46 = vmul.f32 %v1868_v55, %v1868_v55  ;;  %v583_v47 = vmul.f32 %v1882_v62, %v1785_v23  ;;  %v582_v48 = vmul.f32 %v1785_v23, %v1897_v3  ;;  %v786_v9 = vld [vmem:[%s2212_s2 + $0x10] sm:$0xff]  ;;  %s1055_s24 = scalar_lea.sflag [#allocation5], %s2124_s26 }
 0x102   : > { %v671_v41 = vsel %vm375_vm0, %v645_v37, 0.0  ;;  %v668_v42 = vsel %vm375_vm0, %v644_v40, 0.0  ;;  %v695_v49 = vsel %vm375_vm0, %v653_v44, 0.0  ;;  %v591_v57 = vmul.f32 %v1884_v63, %v1785_v23 }
 0x103   : > { %v692_v52 = vsel %vm375_vm0, %v652_v46, 0.0  ;;  %v613_v53 = vsel %vm375_vm0, %v583_v47, 0.0  ;;  %v610_v56 = vsel %vm375_vm0, %v582_v48, 0.0  ;;  %v590_v58 = vmul.f32 %v1785_v23, %v1899_v4 }
 0x104   : > { %681 = vadd.xlane.f32.xlu0 %v680_v11  ;;  %v637_v59 = vsel %vm375_vm0, %v591_v57, 0.0  ;;  %v647_v61 = vmul.f32 %v1882_v62, %v1882_v62  ;;  %v646_v0 = vmul.f32 %v1897_v3, %v1897_v3  ;;  %v655_v23 = vmul.f32 %v1884_v63, %v1884_v63  ;;  %v787_v11 = vld [vmem:[%s2212_s2 + $0x18] sm:$0xff] }
 0x105   : > { %626 = vadd.xlane.f32.xlu1 %v625_v10  ;;  %v634_v60 = vsel %vm375_vm0, %v590_v58, 0.0  ;;  %v654_v5 = vmul.f32 %v1899_v4, %v1899_v4  ;;  %v784_v10 = vld [vmem:[%s2212_s2] sm:$0xff] }
 0x106   : > { %v677_v1 = vsel %vm375_vm0, %v647_v61, 0.0  ;;  %v674_v2 = vsel %vm375_vm0, %v646_v0, 0.0  ;;  %v701_v6 = vsel %vm375_vm0, %v655_v23, 0.0 }
 0x107   : > { %v698_v7 = vsel %vm375_vm0, %v654_v5, 0.0 }
 0x108   : > { %623 = vadd.xlane.f32.xlu0 %v622_v14 }
 0x109   : > { %666 = vadd.xlane.f32.xlu1 %v665_v15 }
 0x10c   : > { %663 = vadd.xlane.f32.xlu0 %v662_v19 }
 0x10d   : > { %690 = vadd.xlane.f32.xlu1 %v689_v18 }
 0x110   : > { %687 = vadd.xlane.f32.xlu0 %v686_v27 }
 0x111   : > { %599 = vadd.xlane.f32.xlu1 %v598_v29 }
 0x114   : > { %605 = vadd.xlane.f32.xlu0 %v604_v32 }
 0x115   : > { %608 = vadd.xlane.f32.xlu1 %v607_v30 }
 0x118   : > { %629 = vadd.xlane.f32.xlu0 %v628_v36 }
 0x119   : > { %632 = vadd.xlane.f32.xlu1 %v631_v35 }
 0x11c   : > { %669 = vadd.xlane.f32.xlu0 %v668_v42 }
 0x11d   : > { %672 = vadd.xlane.f32.xlu1 %v671_v41 }
 0x120   : > { %693 = vadd.xlane.f32.xlu0 %v692_v52 }
 0x121   : > { %696 = vadd.xlane.f32.xlu1 %v695_v49 }
 0x124   : > { %611 = vadd.xlane.f32.xlu0 %v610_v56 }
 0x125   : > { %614 = vadd.xlane.f32.xlu1 %v613_v53 }
 0x128   : > { %635 = vadd.xlane.f32.xlu0 %v634_v60 }
 0x129   : > { %638 = vadd.xlane.f32.xlu1 %v637_v59 }
 0x12c   : > { %675 = vadd.xlane.f32.xlu0 %v674_v2 }
 0x12d   : > { %678 = vadd.xlane.f32.xlu1 %v677_v1 }
 0x130   : > { %699 = vadd.xlane.f32.xlu0 %v698_v7 }
 0x131   : > { %702 = vadd.xlane.f32.xlu1 %v701_v6 }
 0x142   : > { %795 = vperm.xlu1 %1492, %v785_v8  }
 0x146   : > { %800 = vperm.xlu1 %1492, %v786_v9   ;;  %790 = vperm.xlu0 %1491, %v784_v10  }
 0x14a   : > { %805 = vperm.xlu1 %1492, %v787_v11  }
 0x173   : > { %752 = vxpose.xlu1.b32.start [1/16] (narrow) %v1808_v31, 32 }
 0x177   : > { %753 = vxpose.xlu1.b32.cont [2/16] (narrow) %v1794_v24, 32 }
 0x17b   : > { %754 = vxpose.xlu1.b32.cont [3/16] (narrow) %v1836_v43, 32 }
 0x17f   : > { %755 = vxpose.xlu1.b32.cont [4/16] (narrow) %v1828_v38, 32 }
 0x181   : > { %v597_v13 = vpop.xlane.xlu0 %596 }
 0x182   : > { %v621_v12 = vpop.xlane.xlu1 %620  ;;  %1024 = vst.msk [vmem:[%s2007_s12 + $0x8] sm:$0xff] %vm1022_vm2, %v597_v13 }
 0x183   : > { %1032 = vst.msk [vmem:[%s2007_s12 + $0x48] sm:$0xff] %vm1022_vm2, %v621_v12  ;;  %756 = vxpose.xlu1.b32.cont [5/16] (narrow) %v1866_v54, 32 }
 0x185   : > { %v594_v15 = vpop.xlane.xlu0 %593 }
 0x186   : > { %v661_v14 = vpop.xlane.xlu1 %660  ;;  %1023 = vst.msk [vmem:[%s2007_s12] sm:$0xff] %vm1022_vm2, %v594_v15 }
 0x187   : > { %v705_v16 = vmax.f32 %v661_v14, 0.001  ;;  %757 = vxpose.xlu1.b32.cont [6/16] (narrow) %v1858_v50, 32 }
 0x189   : > { %1493 = vrcp.f32 %v705_v16  ;;  %v618_v18 = vpop.xlane.xlu0 %617 }
 0x18a   : > { %v685_v17 = vpop.xlane.xlu1 %684  ;;  %1031 = vst.msk [vmem:[%s2007_s12 + $0x40] sm:$0xff] %vm1022_vm2, %v618_v18 }
 0x18b   : > { %v713_v19 = vmax.f32 %v685_v17, 0.001  ;;  %758 = vxpose.xlu1.b32.cont [7/16] (narrow) %v1897_v3, 32 }
 0x18d   : > { %1495 = vrcp.f32 %v713_v19  ;;  %v658_v20 = vpop.xlane.xlu0 %657 }
 0x18e   : > { %v603_v21 = vpop.xlane.xlu1 %602  ;;  %v704_v22 = vmax.f32 %v658_v20, 0.001 }
 0x18f   : > { %1026 = vst.msk [vmem:[%s2007_s12 + $0x18] sm:$0xff] %vm1022_vm2, %v603_v21  ;;  %759 = vxpose.xlu1.b32.cont [8/16] (narrow) %v1882_v62, 32 }
 0x190   : > { %1497 = vrcp.f32 %v704_v22 }
 0x191   : > { %v682_v26 = vpop.xlane.xlu0 %681 }
 0x192   : > { %v627_v27 = vpop.xlane.xlu1 %626  ;;  %v712_v30 = vmax.f32 %v682_v26, 0.001 }
 0x193   : > { %v1494_v29 = vpop.eup %1493  ;;  %1034 = vst.msk [vmem:[%s2007_s12 + $0x58] sm:$0xff] %vm1022_vm2, %v627_v27  ;;  %760 = vxpose.xlu1.b32.cont [9/16] (narrow) %v1802_v28, 32 }
 0x194   : > { %v723_v32 = vmul.f32 %v1494_v29, %v1794_v24  ;;  %1499 = vrcp.f32 %v712_v30 }
 0x195   : > { %v624_v34 = vpop.xlane.xlu0 %623 }
 0x196   : > { %v1349_v33 = vpack.c.bf16 %v723_v32, %v723_v32  ;;  %v667_v35 = vpop.xlane.xlu1 %666  ;;  %1033 = vst.msk [vmem:[%s2007_s12 + $0x50] sm:$0xff] %vm1022_vm2, %v624_v34 }
 0x197   : > { %v1496_v36 = vpop.eup %1495  ;;  %v707_v37 = vmax.f32 %v667_v35, 0.001  ;;  %761 = vxpose.xlu1.b32.cont [10/16] (narrow) %v1796_v25, 32 }
 0x198   : > { %986 = vst.msk [vmem:[%s2032_s17 + $0x4] sm:$0xf] %vm904_vm1, %v1349_v33  ;;  %v739_v24 = vmul.f32 %v1496_v36, %v1796_v25 }
 0x199   : > { %1501 = vrcp.f32 %v707_v37  ;;  %v664_v42 = vpop.xlane.xlu0 %663 }
 0x19a   : > { %v1357_v40 = vpack.c.bf16 %v739_v24, %v739_v24  ;;  %v691_v41 = vpop.xlane.xlu1 %690  ;;  %v1498_v44 = vpop.eup %1497  ;;  %v706_v47 = vmax.f32 %v664_v42, 0.001 }
 0x19b   : > { %v715_v46 = vmax.f32 %v691_v41, 0.001  ;;  %762 = vxpose.xlu1.b32.cont [11/16] (narrow) %v1840_v45, 32  ;;  %v721_v48 = vmul.f32 %v1498_v44, %v1808_v31 }
 0x19c   : > { %994 = vst.msk [vmem:[%s2032_s17 + $0x24] sm:$0xf] %vm904_vm1, %v1357_v40 }
 0x19d   : > { %1503 = vrcp.f32 %v715_v46  ;;  %v1348_v49 = vpack.c.bf16 %v721_v48, %v721_v48  ;;  %v688_v25 = vpop.xlane.xlu0 %687 }
 0x19e   : > { %1505 = vrcp.f32 %v706_v47  ;;  %v600_v52 = vpop.xlane.xlu1 %599  ;;  %v1500_v53 = vpop.eup %1499  ;;  %v714_v56 = vmax.f32 %v688_v25, 0.001 }
 0x19f   : > { %1025 = vst.msk [vmem:[%s2007_s12 + $0x10] sm:$0xff] %vm1022_vm2, %v600_v52  ;;  %763 = vxpose.xlu1.b32.cont [12/16] (narrow) %v1830_v39, 32  ;;  %v737_v57 = vmul.f32 %v1500_v53, %v1802_v28 }
 0x1a0   : > { %985 = vst.msk [vmem:[%s2032_s17] sm:$0xf] %vm904_vm1, %v1348_v49  ;;  %1507 = vrcp.f32 %v714_v56 }
 0x1a1   : > { %v1356_v31 = vpack.c.bf16 %v737_v57, %v737_v57  ;;  %v606_v59 = vpop.xlane.xlu0 %605 }
 0x1a2   : > { %v609_v58 = vpop.xlane.xlu1 %608  ;;  %1027 = vst.msk [vmem:[%s2007_s12 + $0x20] sm:$0xff] %vm1022_vm2, %v606_v59 }
 0x1a3   : > { %v1502_v60 = vpop.eup %1501  ;;  %1028 = vst.msk [vmem:[%s2007_s12 + $0x28] sm:$0xff] %vm1022_vm2, %v609_v58  ;;  %764 = vxpose.xlu1.b32.cont [13/16] (narrow) %v1868_v55, 32 }
 0x1a4   : > { %993 = vst.msk [vmem:[%s2032_s17 + $0x20] sm:$0xf] %vm904_vm1, %v1356_v31  ;;  %v727_v61 = vmul.f32 %v1502_v60, %v1828_v38 }
 0x1a5   : > { %v630_v28 = vpop.xlane.xlu0 %629 }
 0x1a6   : > { %v1351_v0 = vpack.c.bf16 %v727_v61, %v727_v61  ;;  %v633_v1 = vpop.xlane.xlu1 %632  ;;  %1035 = vst.msk [vmem:[%s2007_s12 + $0x60] sm:$0xff] %vm1022_vm2, %v630_v28 }
 0x1a7   : > { %v1504_v2 = vpop.eup %1503  ;;  %1036 = vst.msk [vmem:[%s2007_s12 + $0x68] sm:$0xff] %vm1022_vm2, %v633_v1  ;;  %765 = vxpose.xlu1.b32.cont [14/16] (narrow) %v1860_v51, 32 }
 0x1a8   : > { %v1506_v23 = vpop.eup %1505  ;;  %988 = vst.msk [vmem:[%s2032_s17 + $0xc] sm:$0xf] %vm904_vm1, %v1351_v0  ;;  %v743_v5 = vmul.f32 %v1504_v2, %v1830_v39 }
 0x1a9   : > { %v725_v6 = vmul.f32 %v1506_v23, %v1836_v43  ;;  %v670_v8 = vpop.xlane.xlu0 %669 }
 0x1aa   : > { %v1359_v38 = vpack.c.bf16 %v743_v5, %v743_v5  ;;  %v673_v7 = vpop.xlane.xlu1 %672  ;;  %v1508_v9 = vpop.eup %1507  ;;  %v708_v12 = vmax.f32 %v670_v8, 0.001 }
 0x1ab   : > { %v1350_v10 = vpack.c.bf16 %v725_v6, %v725_v6  ;;  %v709_v11 = vmax.f32 %v673_v7, 0.001  ;;  %766 = vxpose.xlu1.b32.cont [15/16] (narrow) %v1899_v4, 32  ;;  %v741_v13 = vmul.f32 %v1508_v9, %v1840_v45 }
 0x1ac   : > { %996 = vst.msk [vmem:[%s2032_s17 + $0x2c] sm:$0xf] %vm904_vm1, %v1359_v38 }
 0x1ad   : > { %987 = vst.msk [vmem:[%s2032_s17 + $0x8] sm:$0xf] %vm904_vm1, %v1350_v10  ;;  %1509 = vrcp.f32 %v709_v11  ;;  %v1358_v39 = vpack.c.bf16 %v741_v13, %v741_v13  ;;  %v694_v14 = vpop.xlane.xlu0 %693 }
 0x1ae   : > { %1511 = vrcp.f32 %v708_v12  ;;  %v697_v43 = vpop.xlane.xlu1 %696  ;;  %v716_v16 = vmax.f32 %v694_v14, 0.001 }
 0x1af   : > { %v717_v15 = vmax.f32 %v697_v43, 0.001  ;;  %767 = vxpose.xlu1.b32.end [16/16] (narrow) %v1884_v63, 32  ;;  %995 = vst.msk [vmem:[%s2032_s17 + $0x28] sm:$0xf] %vm904_vm1, %v1358_v39 }
 0x1b1   : > { %1513 = vrcp.f32 %v717_v15  ;;  %v612_v45 = vpop.xlane.xlu0 %611 }
 0x1b2   : > { %1515 = vrcp.f32 %v716_v16  ;;  %v615_v17 = vpop.xlane.xlu1 %614  ;;  %1029 = vst.msk [vmem:[%s2007_s12 + $0x30] sm:$0xff] %vm1022_vm2, %v612_v45 }
 0x1b3   : > { %1030 = vst.msk [vmem:[%s2007_s12 + $0x38] sm:$0xff] %vm1022_vm2, %v615_v17 }
 0x1b5   : > { %v636_v19 = vpop.xlane.xlu0 %635 }
 0x1b6   : > { %v639_v18 = vpop.xlane.xlu1 %638  ;;  %1037 = vst.msk [vmem:[%s2007_s12 + $0x70] sm:$0xff] %vm1022_vm2, %v636_v19 }
 0x1b7   : > { %v1510_v20 = vpop.eup %1509  ;;  %1038 = vst.msk [vmem:[%s2007_s12 + $0x78] sm:$0xff] %vm1022_vm2, %v639_v18  ;;  %s1624_s12 = smov [#allocation4]  }
 0x1b8   : > { %v1512_v21 = vpop.eup %1511  ;;  %v731_v22 = vmul.f32 %v1510_v20, %v1858_v50  ;;  %s1531_s10 = sshll.u32 %s1624_s12, 4  ;;  %s1532_s10 = int_to_ptr.vmem [resolvable:$false] %s1531_s10 }
 0x1b9   : > { %v729_v26 = vmul.f32 %v1512_v21, %v1866_v54  ;;  %v676_v30 = vpop.xlane.xlu0 %675  ;;  %s1533_s13 = scalar_lea.vmem %s1532_s10, 32  ;;  %p1534_p0 = scmp.lt.s32.totalorder %s2133_s19, %s1532_s10 }
 0x1ba   : > { %v1353_v27 = vpack.c.bf16 %v731_v22, %v731_v22  ;;  %v679_v29 = vpop.xlane.xlu1 %678  ;;  %v710_v35 = vmax.f32 %v676_v30, 0.001  ;;  %p1535_p1 = scmp.lt.s32.totalorder %s1533_s13, %s1527_s25 }
 0x1bb   : > { %v1514_v32 = vpop.eup %1513  ;;  %v1352_v33 = vpack.c.bf16 %v729_v26, %v729_v26  ;;  %v711_v34 = vmax.f32 %v679_v29, 0.001 }
 0x1bc   : > { %v1516_v36 = vpop.eup %1515  ;;  %990 = vst.msk [vmem:[%s2032_s17 + $0x14] sm:$0xf] %vm904_vm1, %v1353_v27  ;;  %v747_v37 = vmul.f32 %v1514_v32, %v1860_v51  ;;  %p1536_p2 = por %p1535_p1, %p1534_p0 }
 0x1bd   : > { %989 = vst.msk [vmem:[%s2032_s17 + $0x10] sm:$0xf] %vm904_vm1, %v1352_v33  ;;  %v745_v50 = vmul.f32 %v1516_v36, %v1868_v55  ;;  %1517 = vrcp.f32 %v711_v34  ;;  %v700_v40 = vpop.xlane.xlu0 %699 }
 0x1be   : > { %v1361_v54 = vpack.c.bf16 %v747_v37, %v747_v37  ;;  %1519 = vrcp.f32 %v710_v35  ;;  %v703_v24 = vpop.xlane.xlu1 %702  ;;  %v718_v44 = vmax.f32 %v700_v40, 0.001  ;;  %p1537_p3 = pnand %p1536_p2, %p1530_p13 }
 0x1bf   : > { %v1360_v41 = vpack.c.bf16 %v745_v50, %v745_v50  ;;  %v719_v42 = vmax.f32 %v703_v24, 0.001 }
 0x1c0   : > { %998 = vst.msk [vmem:[%s2032_s17 + $0x34] sm:$0xf] %vm904_vm1, %v1361_v54 }
 0x1c1   : > { %997 = vst.msk [vmem:[%s2032_s17 + $0x30] sm:$0xf] %vm904_vm1, %v1360_v41  ;;  %1521 = vrcp.f32 %v719_v42 }
 0x1c2   : > { %1523 = vrcp.f32 %v718_v44 }
 0x1c5   : > { %v791_v61 = vpop.permute.xlu0 %790 }
 0x1c7   : > { %v1518_v51 = vpop.eup %1517 }
 0x1c8   : > { %v1520_v55 = vpop.eup %1519  ;;  %v735_v46 = vmul.f32 %v1518_v51, %v1882_v62  ;;  %v796_v62 = vpop.permute.xlu1 %795 }
 0x1c9   : > { %v733_v47 = vmul.f32 %v1520_v55, %v1897_v3 }
 0x1ca   : > { %v1355_v48 = vpack.c.bf16 %v735_v46, %v735_v46 }
 0x1cb   : > { %v1522_v49 = vpop.eup %1521  ;;  %v1354_v25 = vpack.c.bf16 %v733_v47, %v733_v47 }
 0x1cc   : > { %v1524_v52 = vpop.eup %1523  ;;  %992 = vst.msk [vmem:[%s2032_s17 + $0x1c] sm:$0xf] %vm904_vm1, %v1355_v48  ;;  %v751_v53 = vmul.f32 %v1522_v49, %v1884_v63  ;;  %v801_v3 = vpop.permute.xlu1 %800 }
 0x1cd   : > { %991 = vst.msk [vmem:[%s2032_s17 + $0x18] sm:$0xf] %vm904_vm1, %v1354_v25  ;;  %v749_v56 = vmul.f32 %v1524_v52, %v1899_v4 }
 0x1ce   : > { %v1363_v57 = vpack.c.bf16 %v751_v53, %v751_v53 }
 0x1cf   : > { %v1362_v31 = vpack.c.bf16 %v749_v56, %v749_v56 }
 0x1d0   : > { %1000 = vst.msk [vmem:[%s2032_s17 + $0x3c] sm:$0xf] %vm904_vm1, %v1363_v57  ;;  %v806_v58 = vpop.permute.xlu1 %805 }
 0x1d1   : > { %999 = vst.msk [vmem:[%s2032_s17 + $0x38] sm:$0xf] %vm904_vm1, %v1362_v31 }
 0x1f3   : > { %v2108_v59 = vpop.trf.xlu1 }
 0x1f4   : > { %v821_v1 = vmul.f32 %v2108_v59, %v2108_v59  ;;  %v808_v28 = vmul.f32 %v791_v61, %v2108_v59 }
 0x1f7   : > { %v2110_v60 = vpop.trf.xlu1 }
 0x1f8   : > { %v809_v63 = vmul.f32 %v796_v62, %v2110_v60  ;;  %v822_v0 = vmul.f32 %v2110_v60, %v2110_v60 }
 0x1fa   : > { %v812_v5 = vadd.f32 %v809_v63, %v808_v28  ;;  %v825_v6 = vadd.f32 %v822_v0, %v821_v1 }
 0x1fb   : > { %v2115_v4 = vpop.trf.xlu1 }
 0x1fc   : > { %v810_v2 = vmul.f32 %v801_v3, %v2115_v4  ;;  %v823_v23 = vmul.f32 %v2115_v4, %v2115_v4 }
 0x1fe   : > { %v813_v7 = vadd.f32 %v812_v5, %v810_v2  ;;  %v826_v8 = vadd.f32 %v825_v6, %v823_v23 }
 0x1ff   : > { %v771_v38 = vpop.trf.xlu1 }
 0x200   : > { %v811_v9 = vmul.f32 %v806_v58, %v771_v38  ;;  %v824_v10 = vmul.f32 %v771_v38, %v771_v38 }
 0x202   : > { %v814_v11 = vadd.f32 %v813_v7, %v811_v9  ;;  %v827_v12 = vadd.f32 %v826_v8, %v824_v10 }
 0x204   : > { %v815_v13 = vrot.slane %v814_v11, 4  ;;  %v828_v39 = vrot.slane %v827_v12, 4 }
 0x206   : > { %v816_v43 = vadd.f32 %v815_v13, %v814_v11  ;;  %v829_v14 = vadd.f32 %v828_v39, %v827_v12 }
 0x208   : > { %v817_v15 = vrot.slane %v816_v43, 2  ;;  %v830_v16 = vrot.slane %v829_v14, 2 }
 0x20a   : > { %v831_v17 = vadd.f32 %v830_v16, %v829_v14  ;;  %v818_v45 = vadd.f32 %v817_v15, %v816_v43 }
 0x20c   : > { %v832_v18 = vrot.slane %v831_v17, 1  ;;  %v819_v19 = vrot.slane %v818_v45, 1 }
 0x20e   : > { %v833_v20 = vadd.f32 %v832_v18, %v831_v17  ;;  %v820_v21 = vadd.f32 %v819_v19, %v818_v45 }
 0x210   : > { %v834_v22 = vmax.f32 %v833_v20, 0.001  ;;  %1021 = vst [vmem:[%s323_s18] sm:$0x1] %v820_v21 }
 0x211   : > { %1540 = shalt.err (!%p1537_p3)
}
 0x212   : > { %s1541_s23 = scalar_lea.hbm %s2131_s22, 16  ;;  %s1545_s20 = scalar_lea.hbm %s2217_s7, 48 }
 0x213   : > { %p1542_p4 = scmp.ne.s32.totalorder %s2131_s22, %s1541_s23  ;;  %p1546_p9 = scmp.lt.u32.totalorder %s2131_s22, %s2217_s7 }
 0x214   : > { %p1547_p10 = scmp.lt.u32.totalorder %s1545_s20, %s1541_s23  ;;  %p1549_p12 = scmp.lt.u32.totalorder %s1541_s23, %s2131_s22 }
 0x215   : > { %p1543_p7 = pnand %p1542_p4, %p1712_p5 }
 0x216   : > { %p1548_p11 = por %p1547_p10, %p1546_p9 }
 0x217   : > { %p1544_p8 = pneg %p1543_p7 }
 0x218   : > { %p1550_p13 = por %p1549_p12, %p1548_p11 }
 0x21a   : > { %p1551_p0 = pnand %p1550_p13, %p1544_p8 }
 0x21c   : > { %1554 = shalt.err (!%p1551_p0)
}
 0x21d   : > { %1444 = dma.vmem_to_hbm [thread:$0]  (%p1712_p5), %s2133_s19, 16, %s2131_s22, %s1055_s24   ;;  %1525 = vrcp.f32 %v834_v22 }
 0x21e   : > { %s1265_s25 = sshll.u32 %s2124_s26, 4  ;;  %s1328_s17 = sshll.u32 %s1695_s9, 6 }
 0x21f   : > { %s317_s10 = scalar_lea.vmem [#allocation2], %s1265_s25  ;;  %s2167_s19 = scalar_lea.hbm %s2216_s6, %s1328_s17 }
 0x220   : > { %s1079_s13 = sshll.u32 %s317_s10, 4  ;;  %s1050_s9 = scalar_lea.sflag [#allocation3], %s2124_s26  ;;  %s2162_s13 = int_to_ptr.vmem [resolvable:$true] %s1079_s13 }
 0x221   : > { %s1555_s22 = scalar_lea.vmem %s2162_s13, 256  ;;  %s1625_s24 = smov [#allocation2]  }
 0x222   : > { %p1556_p1 = scmp.ne.s32.totalorder %s2162_s13, %s1555_s22  ;;  %s1559_s20 = sshll.u32 %s1625_s24, 4  ;;  %s1560_s20 = int_to_ptr.vmem [resolvable:$false] %s1559_s20 }
 0x223   : > { %s1561_s21 = scalar_lea.vmem %s1560_s20, 512  ;;  %p1562_p4 = scmp.lt.s32.totalorder %s2162_s13, %s1560_s20 }
 0x224   : > { %p1557_p2 = pnand %p1556_p1, %p1712_p5  ;;  %p1563_p7 = scmp.lt.s32.totalorder %s1561_s21, %s1555_s22 }
 0x226   : > { %p1558_p3 = pneg %p1557_p2  ;;  %p1564_p8 = por %p1563_p7, %p1562_p4 }
 0x227   : > { %v1526_v26 = vpop.eup %1525 }
 0x228   : > { %v836_v27 = vmul.f32 %v1526_v26, %v2108_v59  ;;  %v837_v29 = vmul.f32 %v1526_v26, %v2110_v60  ;;  %v838_v30 = vmul.f32 %v1526_v26, %v2115_v4  ;;  %v839_v32 = vmul.f32 %v1526_v26, %v771_v38  ;;  %p1565_p9 = pnand %p1564_p8, %p1558_p3 }
 0x22a   : > { %v1371_v33 = vpack.c.bf16 %v837_v29, %v836_v27  ;;  %v1376_v34 = vpack.c.bf16 %v839_v32, %v838_v30 }
 0x22c   : > { %1372 = vst [vmem:[%s317_s10] sm:$0xff] %v1371_v33   ;;  %1378 = vst [vmem:[%s317_s10 + $0x8] sm:$0xff] %v1376_v34  }
 0x22d   : > { %1568 = shalt.err (!%p1565_p9)
}
 0x22e   : > { %s1569_s12 = scalar_lea.hbm %s2167_s19, 256  ;;  %s1573_s17 = scalar_lea.hbm %s2216_s6, 768 }
 0x22f   : > { %p1570_p10 = scmp.ne.s32.totalorder %s2167_s19, %s1569_s12  ;;  %p1574_p13 = scmp.lt.u32.totalorder %s2167_s19, %s2216_s6 }
 0x230   : > { %p1575_p0 = scmp.lt.u32.totalorder %s1573_s17, %s1569_s12  ;;  %p1577_p2 = scmp.lt.u32.totalorder %s1569_s12, %s2167_s19 }
 0x231   : > { %p1571_p11 = pnand %p1570_p10, %p1712_p5 }
 0x232   : > { %p1576_p1 = por %p1575_p0, %p1574_p13 }
 0x233   : > { %p1572_p12 = pneg %p1571_p11 }
 0x234   : > { %p1578_p3 = por %p1577_p2, %p1576_p1 }
 0x236   : > { %p1579_p4 = pnand %p1578_p3, %p1572_p12 }
 0x238   : > { %1582 = shalt.err (!%p1579_p4)
}
 0x239   : > { %s1626_s22 = smov 64   ;;  %s1627_s24 = smov 192  }
 0x23a   : > { %s1628_s20 = smov 4  }
 0x23b   : > { %1443 = dma.vmem_to_hbm [thread:$0]  (%p1712_p5), %s2162_s13, 256, %s2167_s19, %s1050_s9, %s1626_s22, %s1627_s24, %s1628_s20  }
 0x23c PF: > { %p1454_p7 = scmp.ge.s32.totalorder %s1621_s30, 2  ;;  %s1127_s21 = sand.u32 1, %s1609_s27  }
 0x23d   : > { %s1128_s12 = scalar_lea.sflag [#allocation3], %s1127_s21 }
 0x23e   : > { %p1448_p8 = pnand %p1454_p7, %p1716_p6 }
 0x240   : > { %1600 = dma.done.wait (!%p1448_p8), %s1128_s12, 256  }
 0x241   : > { %1602 = vsyncadd (!%p1448_p8), %s1128_s12, 4294967040  ;;  %s1137_s25 = scalar_lea.sflag [#allocation5], %s1127_s21 }
 0x242   : > { %1604 = dma.done.wait (!%p1448_p8), %s1137_s25, 16  }
 0x243   : > { %1606 = vsyncadd (!%p1448_p8), %s1137_s25, 4294967280  ;;  %p22_p5 = scmp.ge.s32.totalorder %s1699_s11, 5   ;;  %s2221_s27 = smov %s1613_s28 }
 0x244   : > { %s2222_s28 = smov %s1617_s29  ;;  %s2223_s29 = smov %s1710_s14 }
 0x245   : > { %s2224_s30 = smov %s1699_s11  ;;  %24 = sbr.rel (!%p22_p5) target bundleno = 5 (0x5), region = 124 }
 0x24c   :  { %1149 = vsyncpa [#allocation3], 1 }
 0x24d   :  { %1151 = vsyncpa [#allocation3 + $0x1], 1 }
 0x24e   :  { %1152 = vsyncpa [#allocation5], 1 }
 0x24f   :  { %1154 = vsyncpa [#allocation5 + $0x1], 1 }

</bundles_post_ra>
